<compile_context>
chip_gen: v6e
topology: v6e:2x2x1
jax: 0.10.0
libtpu: 0.0.40
codegen_flags: <defaults>
</compile_context>

<pallas_src>
import numpy as np
import jax
import jax.numpy as jnp
from jax.experimental import pallas as pl
from jax.experimental.pallas import tpu as pltpu

TEMP = 0.05          # similarity temperature
INV_TEMP = 1.0 / TEMP
COS_EPS = 1e-8       # torch.nn.CosineSimilarity eps


def pooler_contrastive_kernel(e1_ref, e2_ref, w_ref, b_ref, cos_ref, loss_ref):
    B, T, H = e1_ref.shape
    inv_t = jnp.float32(1.0 / T)

    # Fused 'mean_rep' pooling: one vectorized time-mean per view, stacked into
    # a single (2B, H) slab so the MLP runs as ONE matmul (dedup: B unique rows
    # per view, never the B*B duplicated pair rows).
    m1 = jnp.sum(e1_ref[...], axis=1) * inv_t                              # (B, H)
    m2 = jnp.sum(e2_ref[...], axis=1) * inv_t                              # (B, H)
    z = jnp.concatenate([m1, m2], axis=0)                                  # (2B, H)

    # MLPLayer: tanh(x @ W.T + bias).  W stays in torch (out, in) layout; the
    # contraction over dim 1 of both operands is the MXU trans_b form.
    h = jnp.tanh(
        jax.lax.dot_general(
            z, w_ref[...],
            dimension_numbers=(((1,), (1,)), ((), ())),
            preferred_element_type=jnp.float32)
        + b_ref[...])                                                      # (2B, H)

    # Torch CosineSimilarity eps semantics, per-row: 1 / max(||x||, eps) ==
    # min(rsqrt(||x||^2), 1/eps).  Normalizing rows BEFORE the Gram matmul
    # keeps both scale factors as (2B, 1) lane-broadcasts (no relayout).
    nsq = jnp.sum(h * h, axis=1, keepdims=True)                            # (2B, 1)
    inv_n = jnp.minimum(jax.lax.rsqrt(nsq), jnp.float32(1.0 / COS_EPS))
    hn = h * inv_n                                                         # (2B, H)
    h1n = hn[:B]                       # (B, H) normalized view-1 representations
    h2n = hn[B:]                       # (B, H) normalized view-2 representations

    # All B*B pair cosines in one MXU Gram matmul: cos[i, j] = <h1n_i, h2n_j>.
    cos = jax.lax.dot_general(
        h1n, h2n,
        dimension_numbers=(((1,), (1,)), ((), ())),
        preferred_element_type=jnp.float32) * jnp.float32(INV_TEMP)        # (B, B)
    cos_ref[...] = cos                 # row-major pair order: p = i*B + j

    # Labels generated in-kernel: pair (i, j) is positive iff i == j.
    row = jax.lax.broadcasted_iota(jnp.int32, (B, B), 0)
    col = jax.lax.broadcasted_iota(jnp.int32, (B, B), 1)
    y = (row == col).astype(jnp.float32)                                   # (B, B)

    # BCEWithLogitsLoss (mean reduction), numerically stable form.
    per = jnp.maximum(cos, 0.0) - cos * y + jnp.log1p(jnp.exp(-jnp.abs(cos)))
    loss_ref[...] = jnp.mean(per).reshape(1, 1)


def pooler_pair_order(B):
    """Torch Pooler 'mean_rep' pair order (deterministic for B <= 6): per
    patient i, the positive pair (i, i) first, then negatives (i, j), j != i,
    ascending.  Returns indices into the kernel's row-major (i*B + j) layout,
    plus the labels in Pooler order.  Host-side numpy only (free)."""
    order, labels = [], []
    for i in range(B):
        order.append(i * B + i)
        labels.append(1.0)
        for j in range(B):
            if j != i:
                order.append(i * B + j)
                labels.append(0.0)
    return np.asarray(order, np.int32), np.asarray(labels, np.float32)


def pooler_contrastive_forward(embeds, embeds_2, W, b):
    """embeds/embeds_2: (B, T, H) f32 timeline embeddings; W: (H, H) torch
    nn.Linear weight (out, in); b: (H,).  Returns (cos (P,), loss scalar,
    labels (P,)) with P = B*B pairs in row-major (i*B + j) order; use
    pooler_pair_order(B) to permute into the torch Pooler ordering."""
    B, T, H = embeds.shape
    P = B * B
    b2 = jnp.asarray(b, jnp.float32).reshape(1, H)

    grid_spec = pl.GridSpec(
        grid=(1,),
        in_specs=[
            pl.BlockSpec((B, T, H), lambda i: (0, 0, 0)),
            pl.BlockSpec((B, T, H), lambda i: (0, 0, 0)),
            pl.BlockSpec((H, H), lambda i: (0, 0)),
            pl.BlockSpec((1, H), lambda i: (0, 0)),
        ],
        out_specs=[
            pl.BlockSpec((B, B), lambda i: (0, 0)),
            pl.BlockSpec((1, 1), lambda i: (0, 0)),
        ],
    )
    cos_mat, loss = pl.pallas_call(
        pooler_contrastive_kernel,
        out_shape=(
            jax.ShapeDtypeStruct((B, B), jnp.float32),
            jax.ShapeDtypeStruct((1, 1), jnp.float32),
        ),
        grid_spec=grid_spec,
        compiler_params=pltpu.CompilerParams(dimension_semantics=("arbitrary",)),
    )(jnp.asarray(embeds, jnp.float32), jnp.asarray(embeds_2, jnp.float32),
      jnp.asarray(W, jnp.float32), b2)

    labels_rm = np.eye(B, dtype=np.float32).reshape(P)   # host-side, no transfer
    return cos_mat.reshape(P), loss[0, 0], labels_rm


# ----------------------------- reference path -------------------------------

def build_mean_rep_pairs_rowmajor(embeds, embeds_2):
    """Duplicated-row pair construction mirroring the torch Pooler, laid out in
    the kernel's row-major (i*B + j) order."""
    B = embeds.shape[0]
    z1_mean = jnp.mean(embeds, axis=1)     # (B, H)
    z2_mean = jnp.mean(embeds_2, axis=1)   # (B, H)
    z1_pairs = jnp.repeat(z1_mean, B, axis=0)   # (P, H)
    z2_pairs = jnp.tile(z2_mean, (B, 1))        # (P, H)
    labels = np.eye(B, dtype=np.float32).reshape(-1)
    return z1_pairs, z2_pairs, labels


def reference_forward(z1_pairs, z2_pairs, W, b, labels):
    h1 = jnp.tanh(z1_pairs @ W.T + b)
    h2 = jnp.tanh(z2_pairs @ W.T + b)
    dotp = jnp.sum(h1 * h2, axis=-1)
    n1 = jnp.maximum(jnp.linalg.norm(h1, axis=-1), COS_EPS)   # torch eps semantics
    n2 = jnp.maximum(jnp.linalg.norm(h2, axis=-1), COS_EPS)
    cos = dotp / (n1 * n2) / TEMP
    y = labels
    per = jnp.maximum(cos, 0.0) - cos * y + jnp.log1p(jnp.exp(-jnp.abs(cos)))
    return cos, jnp.mean(per)


if __name__ == "__main__":
    B, T, H = 4, 8, 128   # patients, timeline length, clmbr config['size']
    key = jax.random.PRNGKey(0)
    k1, k2, kw, kb = jax.random.split(key, 4)

    # Stand-ins for clmbr_model.timeline_model(batch['rnn']) outputs.
    embeds = jax.random.normal(k1, (B, T, H), jnp.float32)
    embeds_2 = jax.random.normal(k2, (B, T, H), jnp.float32)

    # MLPLayer params (nn.Linear(H, H)), deterministic init.
    W = jax.random.normal(kw, (H, H), jnp.float32) * (1.0 / np.sqrt(H))
    b = jax.random.normal(kb, (H,), jnp.float32) * 0.01

    cos, loss, labels = pooler_contrastive_forward(embeds, embeds_2, W, b)
    jax.block_until_ready((cos, loss))

    z1_pairs, z2_pairs, labels_ref = build_mean_rep_pairs_rowmajor(embeds, embeds_2)
    cos_ref, loss_ref = reference_forward(z1_pairs, z2_pairs, W, b,
                                          jnp.asarray(labels_ref))

    assert np.array_equal(np.asarray(labels), labels_ref)
    assert np.allclose(np.asarray(cos), np.asarray(cos_ref), rtol=1e-4, atol=2e-4)
    assert np.allclose(np.asarray(loss), np.asarray(loss_ref), rtol=1e-4, atol=1e-4)

    # Sanity: the host-side permutation reproduces the torch Pooler ordering
    # (loss is order-invariant; cos is just permuted).
    order, labels_pooler = pooler_pair_order(B)
    assert np.array_equal(np.asarray(labels)[order], labels_pooler)

    print("KERNEL_OK")
</pallas_src>

<mosaic_0001>
module attributes {stable_mosaic.version = 11 : i64} {
  func.func @pooler_contrastive_kernel(%arg0: i32, %arg1: memref<4x8x128xf32, #tpu.memory_space<vmem>>, %arg2: memref<4x8x128xf32, #tpu.memory_space<vmem>>, %arg3: memref<128x128xf32, #tpu.memory_space<vmem>>, %arg4: memref<1x128xf32, #tpu.memory_space<vmem>>, %arg5: memref<4x4xf32, #tpu.memory_space<vmem>>, %arg6: memref<1x1xf32, #tpu.memory_space<vmem>>) attributes {dimension_semantics = [#tpu.dimension_semantics<arbitrary>], iteration_bounds = array<i64: 1>, scalar_prefetch = 0 : i64, scratch_operands = 0 : i64, tpu.core_type = #tpu.core_type<tc>, window_params = [{pipeline_mode = #tpu.pipeline_mode<synchronous>, transform_indices = @transform_0, window_bounds = array<i64: 4, 8, 128>}, {pipeline_mode = #tpu.pipeline_mode<synchronous>, transform_indices = @transform_1, window_bounds = array<i64: 4, 8, 128>}, {pipeline_mode = #tpu.pipeline_mode<synchronous>, transform_indices = @transform_2, window_bounds = array<i64: 128, 128>}, {pipeline_mode = #tpu.pipeline_mode<synchronous>, transform_indices = @transform_3, window_bounds = array<i64: 1, 128>}, {pipeline_mode = #tpu.pipeline_mode<synchronous>, transform_indices = @transform_4, window_bounds = array<i64: 4, 4>}, {pipeline_mode = #tpu.pipeline_mode<synchronous>, transform_indices = @transform_5, window_bounds = array<i64: 1, 1>}]} {
    %c0 = arith.constant 0 : index
    %c0_0 = arith.constant 0 : index
    %c0_1 = arith.constant 0 : index
    %0 = vector.load %arg1[%c0, %c0_0, %c0_1] : memref<4x8x128xf32, #tpu.memory_space<vmem>>, vector<4x8x128xf32>
    %cst = arith.constant dense<0.000000e+00> : vector<4x128xf32>
    %1 = vector.multi_reduction <add>, %0, %cst [1] : vector<4x8x128xf32> to vector<4x128xf32>
    %cst_2 = arith.constant 1.250000e-01 : f32
    %2 = vector.broadcast %cst_2 : f32 to vector<4x128xf32>
    %3 = arith.mulf %1, %2 : vector<4x128xf32>
    %c0_3 = arith.constant 0 : index
    %c0_4 = arith.constant 0 : index
    %c0_5 = arith.constant 0 : index
    %4 = vector.load %arg2[%c0_3, %c0_4, %c0_5] : memref<4x8x128xf32, #tpu.memory_space<vmem>>, vector<4x8x128xf32>
    %cst_6 = arith.constant dense<0.000000e+00> : vector<4x128xf32>
    %5 = vector.multi_reduction <add>, %4, %cst_6 [1] : vector<4x8x128xf32> to vector<4x128xf32>
    %cst_7 = arith.constant 1.250000e-01 : f32
    %6 = vector.broadcast %cst_7 : f32 to vector<4x128xf32>
    %7 = arith.mulf %5, %6 : vector<4x128xf32>
    %8 = tpu.concatenate %3, %7 in 0 : vector<4x128xf32>, vector<4x128xf32> -> vector<8x128xf32>
    %c0_8 = arith.constant 0 : index
    %c0_9 = arith.constant 0 : index
    %9 = vector.load %arg3[%c0_8, %c0_9] : memref<128x128xf32, #tpu.memory_space<vmem>>, vector<128x128xf32>
    %cst_10 = arith.constant dense<0.000000e+00> : vector<8x128xf32>
    %10 = tpu.matmul %8, %9, %cst_10 {dimension_numbers = #tpu.dot_dimension_numbers<[1], [1], [0], [0], [0, 0, 1, 0], [], []>} : vector<8x128xf32>, vector<128x128xf32>, vector<8x128xf32> -> vector<8x128xf32>
    %c0_11 = arith.constant 0 : index
    %c0_12 = arith.constant 0 : index
    %11 = vector.load %arg4[%c0_11, %c0_12] : memref<1x128xf32, #tpu.memory_space<vmem>>, vector<1x128xf32>
    %12 = vector.broadcast %11 : vector<1x128xf32> to vector<8x128xf32>
    %13 = arith.addf %10, %12 : vector<8x128xf32>
    %14 = math.tanh %13 : vector<8x128xf32>
    %15 = arith.mulf %14, %14 : vector<8x128xf32>
    %cst_13 = arith.constant dense<0.000000e+00> : vector<8xf32>
    %16 = vector.multi_reduction <add>, %15, %cst_13 [1] : vector<8x128xf32> to vector<8xf32>
    %17 = vector.shape_cast %16 : vector<8xf32> to vector<8x1xf32>
    %18 = math.rsqrt %17 : vector<8x1xf32>
    %cst_14 = arith.constant 1.000000e+08 : f32
    %19 = vector.broadcast %cst_14 : f32 to vector<8x1xf32>
    %20 = arith.minimumf %18, %19 : vector<8x1xf32>
    %21 = vector.broadcast %20 : vector<8x1xf32> to vector<8x128xf32>
    %22 = arith.mulf %14, %21 : vector<8x128xf32>
    %23 = vector.extract_strided_slice %22 {offsets = [0, 0], sizes = [4, 128], strides = [1, 1]} : vector<8x128xf32> to vector<4x128xf32>
    %24 = vector.extract_strided_slice %22 {offsets = [4, 0], sizes = [4, 128], strides = [1, 1]} : vector<8x128xf32> to vector<4x128xf32>
    %cst_15 = arith.constant dense<0.000000e+00> : vector<4x4xf32>
    %25 = tpu.matmul %23, %24, %cst_15 {dimension_numbers = #tpu.dot_dimension_numbers<[1], [1], [0], [0], [0, 0, 1, 0], [], []>} : vector<4x128xf32>, vector<4x128xf32>, vector<4x4xf32> -> vector<4x4xf32>
    %cst_16 = arith.constant 2.000000e+01 : f32
    %26 = vector.broadcast %cst_16 : f32 to vector<4x4xf32>
    %27 = arith.mulf %25, %26 : vector<4x4xf32>
    %c0_17 = arith.constant 0 : index
    %c0_18 = arith.constant 0 : index
    %28 = vector.load %arg5[%c0_17, %c0_18] : memref<4x4xf32, #tpu.memory_space<vmem>>, vector<4x4xf32>
    tpu.vector_store %arg5[%c0_17, %c0_18], %27 {strides = array<i32>} : memref<4x4xf32, #tpu.memory_space<vmem>>, vector<4x4xf32>,
    %29 = tpu.iota {dimensions = array<i32: 0>} : vector<4x4xi32>
    %30 = tpu.iota {dimensions = array<i32: 1>} : vector<4x4xi32>
    %31 = arith.cmpi eq, %29, %30 : vector<4x4xi32>
    %32 = arith.extui %31 : vector<4x4xi1> to vector<4x4xi32>
    %33 = arith.sitofp %32 : vector<4x4xi32> to vector<4x4xf32>
    %cst_19 = arith.constant 0.000000e+00 : f32
    %34 = vector.broadcast %cst_19 : f32 to vector<4x4xf32>
    %35 = arith.maximumf %27, %34 : vector<4x4xf32>
    %36 = arith.mulf %27, %33 : vector<4x4xf32>
    %37 = arith.subf %35, %36 : vector<4x4xf32>
    %38 = math.absf %27 : vector<4x4xf32>
    %cst_20 = arith.constant 0.000000e+00 : f32
    %39 = vector.broadcast %cst_20 : f32 to vector<4x4xf32>
    %40 = arith.subf %39, %38 : vector<4x4xf32>
    %41 = math.exp %40 : vector<4x4xf32>
    %42 = math.log1p %41 : vector<4x4xf32>
    %43 = arith.addf %37, %42 : vector<4x4xf32>
    %44 = vector.shape_cast %43 : vector<4x4xf32> to vector<1x4x4xf32>
    %cst_21 = arith.constant dense<0.000000e+00> : vector<1xf32>
    %45 = vector.multi_reduction <add>, %44, %cst_21 [1, 2] : vector<1x4x4xf32> to vector<1xf32>
    %46 = vector.shape_cast %45 : vector<1xf32> to vector<1x1x1xf32>
    %47 = vector.extract %46[0, 0, 0] : f32 from vector<1x1x1xf32>
    %cst_22 = arith.constant 1.600000e+01 : f32
    %48 = arith.divf %47, %cst_22 : f32
    %49 = vector.broadcast %48 : f32 to vector<1x1xf32>
    %c0_23 = arith.constant 0 : index
    %c0_24 = arith.constant 0 : index
    %50 = vector.load %arg6[%c0_23, %c0_24] : memref<1x1xf32, #tpu.memory_space<vmem>>, vector<1x1xf32>
    tpu.vector_store %arg6[%c0_23, %c0_24], %49 {strides = array<i32>} : memref<1x1xf32, #tpu.memory_space<vmem>>, vector<1x1xf32>,
    return
  }
  func.func @transform_0(%arg0: i32) -> (i32, i32, i32) {
    %c0_i32 = arith.constant 0 : i32
    %c0_i32_0 = arith.constant 0 : i32
    %c0_i32_1 = arith.constant 0 : i32
    %c0_i32_2 = arith.constant 0 : i32
    return %c0_i32, %c0_i32_0, %c0_i32_1 : i32, i32, i32
  }
  func.func @transform_1(%arg0: i32) -> (i32, i32, i32) {
    %c0_i32 = arith.constant 0 : i32
    %c0_i32_0 = arith.constant 0 : i32
    %c0_i32_1 = arith.constant 0 : i32
    %c0_i32_2 = arith.constant 0 : i32
    return %c0_i32, %c0_i32_0, %c0_i32_1 : i32, i32, i32
  }
  func.func @transform_2(%arg0: i32) -> (i32, i32) {
    %c0_i32 = arith.constant 0 : i32
    %c0_i32_0 = arith.constant 0 : i32
    %c0_i32_1 = arith.constant 0 : i32
    return %c0_i32, %c0_i32_0 : i32, i32
  }
  func.func @transform_3(%arg0: i32) -> (i32, i32) {
    %c0_i32 = arith.constant 0 : i32
    %c0_i32_0 = arith.constant 0 : i32
    %c0_i32_1 = arith.constant 0 : i32
    return %c0_i32, %c0_i32_0 : i32, i32
  }
  func.func @transform_4(%arg0: i32) -> (i32, i32) {
    %c0_i32 = arith.constant 0 : i32
    %c0_i32_0 = arith.constant 0 : i32
    %c0_i32_1 = arith.constant 0 : i32
    return %c0_i32, %c0_i32_0 : i32, i32
  }
  func.func @transform_5(%arg0: i32) -> (i32, i32) {
    %c0_i32 = arith.constant 0 : i32
    %c0_i32_0 = arith.constant 0 : i32
    %c0_i32_1 = arith.constant 0 : i32
    return %c0_i32, %c0_i32_0 : i32, i32
  }
}

</mosaic_0001>

<bundles_post_ra>
// kernel: tpu_custom_call.1
= control target key start
LH: loop header
LB: loop body
LE: loop exit
PB: predicated region body
PF: predicated region fallthrough
CT: control target
= control target key end

     0   :  { %11 = vsyncpa [#allocation3], 0  ;;  %s663_s0 = inlined_call_operand.hbm [shape: f32[4,8,128], index: 0, kind: input, shape index: {}]   ;;  %s664_s1 = inlined_call_operand.hbm [shape: f32[4,8,128], index: 1, kind: input, shape index: {}]   ;;  %s665_s2 = inlined_call_operand.hbm [shape: f32[128,128], index: 2, kind: input, shape index: {}]   ;;  %s666_s3 = inlined_call_operand.vmem [shape: f32[1,128], index: 3, kind: input, shape index: {}]   ;;  %s667_s4 = inlined_call_operand.hbm [shape: f32[4,4], index: 4, kind: output, shape index: {0}]   ;;  %s668_s5 = inlined_call_operand.hbm [shape: f32[1,1], index: 5, kind: output, shape index: {1}]  }
   0x1   :  { %12 = vsyncpa [#allocation6], 0 }
   0x2   :  { %13 = vsyncpa [#allocation4], 0 }
   0x3   :  { %14 = vsyncpa [#allocation10], 0  ;;  %s584_s18 = smov [#allocation5]   ;;  %s585_s20 = smov [#allocation2]  }
   0x4   :  { %s32_s19 = sshll.u32 %s584_s18, 4  ;;  %s20_s21 = sshll.u32 %s585_s20, 4  ;;  %s33_s19 = int_to_ptr.vmem [resolvable:$true] %s32_s19  ;;  %s21_s21 = int_to_ptr.vmem [resolvable:$true] %s20_s21 }
   0x5   :  { %s484_s22 = scalar_lea.vmem %s33_s19, 512  ;;  %p489_p1 = scmp.lt.s32.totalorder %s33_s19, %s33_s19 }
   0x6   :  { %p485_p0 = scmp.ne.s32.totalorder %s33_s19, %s484_s22  ;;  %p490_p2 = scmp.lt.s32.totalorder %s484_s22, %s484_s22 }
   0x8   :  { %p491_p3 = por %p490_p2, %p489_p1 }
   0xa   :  { %p492_p4 = pnand %p491_p3, %p485_p0 }
   0xc   :  { %495 = shalt.err (!%p492_p4)
}
   0xd   :  { %s586_s23 = smov 128   ;;  %s587_s24 = smov 8  }
   0xe   :  { %38 = dma.hbm_to_vmem [thread:$0]  %s664_s1, 512, %s33_s19, [#allocation6], %s586_s23, %s586_s23, %s587_s24  }
   0xf   :  { %s504_s27 = scalar_lea.vmem %s21_s21, 512  ;;  %p509_p6 = scmp.lt.s32.totalorder %s21_s21, %s21_s21 }
  0x10   :  { %p505_p5 = scmp.ne.s32.totalorder %s21_s21, %s504_s27  ;;  %p510_p7 = scmp.lt.s32.totalorder %s504_s27, %s504_s27 }
  0x12   :  { %p511_p8 = por %p510_p7, %p509_p6 }
  0x14   :  { %p512_p9 = pnand %p511_p8, %p505_p5 }
  0x16   :  { %515 = shalt.err (!%p512_p9)
}
  0x17   :  { %26 = dma.hbm_to_vmem [thread:$0]  %s663_s0, 512, %s21_s21, [#allocation3], %s586_s23, %s586_s23, %s587_s24  }
  0x18   :  { %s588_s30 = smov [#allocation7]  }
  0x19   :  { %s44_s6 = sshll.u32 %s588_s30, 4  ;;  %s45_s6 = int_to_ptr.vmem [resolvable:$true] %s44_s6 }
  0x1a   :  { %s524_s7 = scalar_lea.vmem %s45_s6, 2048  ;;  %p529_p11 = scmp.lt.s32.totalorder %s45_s6, %s45_s6 }
  0x1b   :  { %p525_p10 = scmp.ne.s32.totalorder %s45_s6, %s524_s7  ;;  %p530_p12 = scmp.lt.s32.totalorder %s524_s7, %s524_s7 }
  0x1d   :  { %p531_p13 = por %p530_p12, %p529_p11 }
  0x1f   :  { %p532_p0 = pnand %p531_p13, %p525_p10 }
  0x21   :  { %535 = shalt.err (!%p532_p0)
}
  0x22   :  { %50 = dma.hbm_to_vmem [thread:$0]  %s665_s2, 2048, %s45_s6, [#allocation6], %s586_s23, %s586_s23, %s587_s24  }
  0x23   :  { %576 = dma.done.wait [#allocation3], 512  }
  0x24   :  { %577 = vsyncadd [#allocation3], 4294966784 }
  0x25   :  { %578 = dma.done.wait [#allocation6], 2560  }
  0x26   :  { %579 = vsyncadd [#allocation6], 4294964736  ;;  %v589_v0 = vmov 0.0   ;;  %vm590_vm0 = vmmov 0   ;;  %v165_v1 = vld [vmem:[#allocation7 + $0x78] sm:$0xff]  ;;  %v164_v2 = vld [vmem:[#allocation7 + $0x70] sm:$0xff] }
  0x27   :  { %417 = vmatprep.subr.mxu0 %v589_v0  ;;  %449 = vmatprep.mubr.msk.f32.mxu0 %vm590_vm0, %v589_v0  ;;  %v163_v3 = vld [vmem:[#allocation7 + $0x68] sm:$0xff]  ;;  %v162_v4 = vld [vmem:[#allocation7 + $0x60] sm:$0xff]  ;;  %v161_v5 = vld [vmem:[#allocation7 + $0x58] sm:$0xff]  ;;  %vm130_vm1 = vcmask 1041409   ;;  %vm141_vm2 = vcmask 1045509   ;;  %vm132_vm3 = vcmask 1042434  }
  0x28   :  { %452 = vmatprep.subr.mxu1 %v589_v0  ;;  %454 = vmatprep.mubr.msk.f32.mxu1 %vm590_vm0, %v589_v0  ;;  %v160_v6 = vld [vmem:[#allocation7 + $0x50] sm:$0xff]  ;;  %v62_v7 = vld [vmem:[#allocation2] sm:$0xff]  ;;  %v63_v8 = vld [vmem:[#allocation2 + $0x8] sm:$0xff]  ;;  %vm143_vm4 = vcmask 1046534   ;;  %vm134_vm5 = vcmask 1043459   ;;  %vm145_vm6 = vcmask 1047559  }
  0x29   :  { %418 = vmatpush3.xpose.msra.mxu0 %v165_v1  ;;  %v94_v9 = vld [vmem:[#allocation5] sm:$0xff]  ;;  %v95_v10 = vld [vmem:[#allocation5 + $0x8] sm:$0xff]  ;;  %v64_v12 = vld [vmem:[#allocation2 + $0x10] sm:$0xff]  ;;  %v66_v13 = vrot.slane %v62_v7, 4  ;;  %v72_v14 = vrot.slane %v63_v8, 4  ;;  %vm148_vm7 = vcmask 1043456  }
  0x2a   :  { %419 = vmatprep.subr.mxu0 %v589_v0  ;;  %v159_v11 = vld [vmem:[#allocation7 + $0x48] sm:$0xff]  ;;  %v96_v15 = vld [vmem:[#allocation5 + $0x10] sm:$0xff]  ;;  %v98_v16 = vrot.slane %v94_v9, 4  ;;  %v104_v17 = vrot.slane %v95_v10, 4  ;;  %v158_v18 = vld [vmem:[#allocation7 + $0x40] sm:$0xff]  ;;  %v78_v20 = vrot.slane %v64_v12, 4 }
  0x2b   :  { %v65_v19 = vld [vmem:[#allocation2 + $0x18] sm:$0xff]  ;;  %v110_v22 = vrot.slane %v96_v15, 4  ;;  %v67_v23 = vadd.f32 %v66_v13, %v62_v7  ;;  %v73_v24 = vadd.f32 %v72_v14, %v63_v8  ;;  %v156_v36 = vld [vmem:[#allocation7 + $0x30] sm:$0xff]  ;;  %v155_v45 = vld [vmem:[#allocation7 + $0x28] sm:$0xff]  ;;  %vm324_vm8 = vcmask 27648  }
  0x2c   :  { %v97_v21 = vld [vmem:[#allocation5 + $0x18] sm:$0xff]  ;;  %v99_v25 = vadd.f32 %v98_v16, %v94_v9  ;;  %v105_v26 = vadd.f32 %v104_v17, %v95_v10  ;;  %v84_v28 = vrot.slane %v65_v19, 4  ;;  %v79_v30 = vadd.f32 %v78_v20, %v64_v12  ;;  %v154_v54 = vld [vmem:[#allocation7 + $0x20] sm:$0xff]  ;;  %v152_v9 = vld [vmem:[#allocation7 + $0x10] sm:$0xff] }
  0x2d   :  { %420 = vmatpush3.xpose.msra.mxu0 %v164_v2  ;;  %v157_v27 = vld [vmem:[#allocation7 + $0x38] sm:$0xff]  ;;  %v116_v29 = vrot.slane %v97_v21, 4  ;;  %v111_v31 = vadd.f32 %v110_v22, %v96_v15  ;;  %v68_v32 = vrot.slane %v67_v23, 2  ;;  %v74_v33 = vrot.slane %v73_v24, 2  ;;  %v151_v16 = vld [vmem:[#allocation7 + $0x8] sm:$0xff] }
  0x2e   :  { %421 = vmatprep.subr.mxu0 %v589_v0  ;;  %v100_v34 = vrot.slane %v99_v25, 2  ;;  %v106_v35 = vrot.slane %v105_v26, 2  ;;  %v85_v37 = vadd.f32 %v84_v28, %v65_v19  ;;  %v80_v39 = vrot.slane %v79_v30, 2  ;;  %v153_v63 = vld [vmem:[#allocation7 + $0x18] sm:$0xff] }
  0x2f   :  { %v117_v38 = vadd.f32 %v116_v29, %v97_v21  ;;  %v112_v40 = vrot.slane %v111_v31, 2  ;;  %v69_v41 = vadd.f32 %v68_v32, %v67_v23  ;;  %v75_v42 = vadd.f32 %v74_v33, %v73_v24  ;;  %v150_v21 = vld [vmem:[#allocation7] sm:$0xff] }
  0x30   :  { %v101_v43 = vadd.f32 %v100_v34, %v99_v25  ;;  %v107_v44 = vadd.f32 %v106_v35, %v105_v26  ;;  %v86_v46 = vrot.slane %v85_v37, 2  ;;  %v81_v48 = vadd.f32 %v80_v39, %v79_v30  ;;  %v396_v25 = vld [vmem:[%s666_s3] ss:$0 sm:$0xff]  ;;  %s591_s3 = smov [#allocation8]  }
  0x31   :  { %422 = vmatpush3.xpose.msra.mxu0 %v163_v3  ;;  %v118_v47 = vrot.slane %v117_v38, 2  ;;  %v113_v49 = vadd.f32 %v112_v40, %v111_v31  ;;  %v70_v50 = vrot.slane %v69_v41, 1  ;;  %v76_v51 = vrot.slane %v75_v42, 1  ;;  %s372_s9 = sshll.u32 %s591_s3, 4  ;;  %s373_s9 = int_to_ptr.vmem [resolvable:$true] %s372_s9 }
  0x32   :  { %423 = vmatprep.subr.mxu0 %v589_v0  ;;  %v102_v52 = vrot.slane %v101_v43, 1  ;;  %v108_v53 = vrot.slane %v107_v44, 1  ;;  %v87_v55 = vadd.f32 %v86_v46, %v85_v37  ;;  %v82_v57 = vrot.slane %v81_v48, 1  ;;  %s536_s10 = scalar_lea.vmem %s373_s9, 64  ;;  %p541_p2 = scmp.lt.s32.totalorder %s373_s9, %s373_s9 }
  0x33   :  { %v119_v56 = vadd.f32 %v118_v47, %v117_v38  ;;  %v114_v58 = vrot.slane %v113_v49, 1  ;;  %v71_v59 = vadd.f32 %v70_v50, %v69_v41  ;;  %v77_v60 = vadd.f32 %v76_v51, %v75_v42  ;;  %p537_p1 = scmp.ne.s32.totalorder %s373_s9, %s536_s10  ;;  %p542_p3 = scmp.lt.s32.totalorder %s536_s10, %s536_s10 }
  0x34   :  { %v103_v61 = vadd.f32 %v102_v52, %v101_v43  ;;  %v109_v62 = vadd.f32 %v108_v53, %v107_v44  ;;  %v88_v1 = vrot.slane %v87_v55, 1  ;;  %v83_v3 = vadd.f32 %v82_v57, %v81_v48 }
  0x35   :  { %424 = vmatpush3.xpose.msra.mxu0 %v162_v4  ;;  %v120_v2 = vrot.slane %v119_v56, 1  ;;  %v115_v4 = vadd.f32 %v114_v58, %v113_v49  ;;  %v326_v43 = vlaneseq  ;;  %p543_p4 = por %p542_p3, %p541_p2 }
  0x36   :  { %425 = vmatprep.subr.mxu0 %v589_v0  ;;  %v122_v7 = vmul.f32 0.125, %v103_v61  ;;  %v123_v8 = vmul.f32 0.125, %v109_v62  ;;  %v89_v10 = vadd.f32 %v88_v1, %v87_v55  ;;  %v92_v12 = vmul.f32 0.125, %v83_v3 }
  0x37   :  { %v124_v13 = vmul.f32 0.125, %v115_v4  ;;  %v329_v46 = vand.u32 127, %v326_v43  ;;  %p544_p5 = pnand %p543_p4, %p537_p1 }
  0x38   :  { %v142_v15 = vsel %vm141_vm2, %v123_v8, %v122_v7  ;;  %v93_v17 = vmul.f32 0.125, %v89_v10 }
  0x39   :  { %426 = vmatpush3.xpose.msra.mxu0 %v161_v5  ;;  %v90_v5 = vmul.f32 0.125, %v71_v59  ;;  %v144_v20 = vsel %vm143_vm4, %v124_v13, %v142_v15 }
  0x3a   :  { %427 = vmatprep.subr.mxu0 %v589_v0 }
  0x3d   :  { %428 = vmatpush3.xpose.msra.mxu0 %v160_v6  ;;  %v91_v6 = vmul.f32 0.125, %v77_v60 }
  0x3e   :  { %429 = vmatprep.subr.mxu0 %v589_v0 }
  0x3f   :  { %v131_v14 = vsel %vm130_vm1, %v91_v6, %v90_v5 }
  0x40   :  { %v133_v19 = vsel %vm132_vm3, %v92_v12, %v131_v14 }
  0x41   :  { %430 = vmatpush3.xpose.msra.mxu0 %v159_v11  ;;  %v121_v11 = vadd.f32 %v120_v2, %v119_v56  ;;  %v135_v22 = vsel %vm134_vm5, %v93_v17, %v133_v19 }
  0x42   :  { %431 = vmatprep.subr.mxu0 %v589_v0 }
  0x45   :  { %432 = vmatpush3.xpose.msra.mxu0 %v158_v18  ;;  %v125_v18 = vmul.f32 0.125, %v121_v11 }
  0x46   :  { %433 = vmatprep.subr.mxu0 %v589_v0 }
  0x47   :  { %v146_v23 = vsel %vm145_vm6, %v125_v18, %v144_v20 }
  0x48   :  { %v149_v24 = vsel %vm148_vm7, %v135_v22, %v146_v23 }
  0x49   :  { %434 = vmatpush3.xpose.msra.mxu0 %v157_v27 }
  0x4a   :  { %435 = vmatprep.subr.mxu0 %v589_v0 }
  0x4d   :  { %436 = vmatpush3.xpose.msra.mxu0 %v156_v36 }
  0x4e   :  { %437 = vmatprep.subr.mxu0 %v589_v0 }
  0x51   :  { %438 = vmatpush3.xpose.msra.mxu0 %v155_v45  ;;  %v327_v45 = vshrl.u32 %v326_v43, 7 }
  0x52   :  { %439 = vmatprep.subr.mxu0 %v589_v0 }
  0x53   :  { %vm330_vm9 = vcmp.eq.s32.totalorder %v327_v45, %v329_v46 }
  0x54   :  { %v397_v48 = vsel %vm330_vm9, 1.0, %v589_v0 }
  0x55   :  { %440 = vmatpush3.xpose.msra.mxu0 %v154_v54 }
  0x56   :  { %441 = vmatprep.subr.mxu0 %v589_v0 }
  0x59   :  { %442 = vmatpush3.xpose.msra.mxu0 %v153_v63 }
  0x5a   :  { %443 = vmatprep.subr.mxu0 %v589_v0 }
  0x5d   :  { %444 = vmatpush3.xpose.msra.mxu0 %v152_v9 }
  0x5e   :  { %445 = vmatprep.subr.mxu0 %v589_v0 }
  0x61   :  { %446 = vmatpush3.xpose.msra.mxu0 %v151_v16 }
  0x62   :  { %447 = vmatprep.subr.mxu0 %v589_v0 }
  0x65   :  { %448 = vmatpush3.xpose.msra.mxu0 %v150_v21 }
  0x68   :  { %450 = vmatmul.mubr.f32.vlgmr.msra.gmra.mxu0 %v149_v24 }
 0x128   :  { %v239_v26 = vpop.f32.mrf.mxu0 }
 0x129   :  { %v240_v27 = vadd.f32 %v396_v25, %v239_v26 }
 0x12a   :  { %v451_v28 = vpop.f32.mrf.mxu0 }
 0x12b   :  { %468 = vtanh.f32 %v240_v27 }
 0x138   :  { %v469_v29 = vpop.eup %468 }
 0x139   :  { %v244_v30 = vmul.f32 %v469_v29, %v469_v29 }
 0x13b   :  { %245 = vadd.xlane.f32.xlu0 %v244_v30 }
 0x1c4   :  { %v246_v31 = vpop.xlane.xlu0 %245 }
 0x1c5   :  { %470 = vrsqrt.f32 %v246_v31 }
 0x1d2   :  { %v471_v32 = vpop.eup %470 }
 0x1d3   :  { %v248_v33 = vmin.f32 %v471_v32, 1e+08 }
 0x1d5   :  { %v249_v34 = vmul.f32 %v469_v29, %v248_v33 }
 0x1d7   :  { %v251_v35 = vrot.slane %v249_v34, 4 }
 0x1d9   :  { %453 = vmatpush3.xpose.msra.mxu1 %v251_v35 }
 0x1dc   :  { %455 = vmatmul.mubr.f32.vlgmr.msra.gmra.mxu1 %v249_v34 }
 0x29c   :  { %v319_v36 = vpop.f32.mrf.mxu1 }
 0x29d   :  { %v323_v37 = vmul.f32 20.0, %v319_v36 }
 0x29e   :  { %v456_v38 = vpop.f32.mrf.mxu1 }
 0x29f   :  { %v336_v39 = vand.u32 2147483647, %v323_v37  ;;  %325 = vst.msk [vmem:[#allocation8] sm:$0xf] %vm324_vm8, %v323_v37  ;;  %v333_v50 = vmax.f32 %v323_v37, 0.0  ;;  %v334_v51 = vmul.f32 %v397_v48, %v323_v37 }
 0x2a1   :  { %v337_v40 = vsub.f32 0.0, %v336_v39  ;;  %v335_v56 = vsub.f32 %v333_v50, %v334_v51 }
 0x2a3   :  { %v338_v41 = vmul.f32 1.442695, %v337_v40 }
 0x2a5   :  { %472 = vpow2.f32 %v338_v41 }
 0x2b2   :  { %v473_v42 = vpop.eup %472 }
 0x2b3   :  { %v340_v44 = vadd.f32 1.0, %v473_v42  ;;  %v343_v47 = vmul.f32 -0.5, %v473_v42  ;;  %v346_v52 = vand.u32 2147483647, %v473_v42 }
 0x2b5   :  { %474 = vlog2.f32 %v340_v44  ;;  %v344_v49 = vadd.f32 1.0, %v343_v47  ;;  %vm347_vm10 = vcmp.lt.f32.partialorder %v346_v52, 0.0004427343 }
 0x2b7   :  { %v345_v55 = vmul.f32 %v473_v42, %v344_v49 }
 0x2c2   :  { %v475_v53 = vpop.eup %474 }
 0x2c3   :  { %v342_v54 = vmul.f32 0.6931472, %v475_v53 }
 0x2c5   :  { %v348_v57 = vsel %vm347_vm10, %v345_v55, %v342_v54 }
 0x2c6   :  { %v349_v58 = vadd.f32 %v348_v57, %v335_v56 }
 0x2c8   :  { %v350_v59 = vsel %vm324_vm8, %v349_v58, 0.0 }
 0x2c9   :  { %351 = vadd.xlane.f32.xlu0 %v350_v59 }
 0x2ca   :  { %547 = shalt.err (!%p544_p5)
}
 0x2cb   :  { %375 = dma.vmem_to_hbm [thread:$0]  %s373_s9, 64, %s667_s4, [#allocation4]   ;;  %vm364_vm11 = vcmask 0  }
 0x2cc   :  { %s592_s13 = smov [#allocation9]  }
 0x2cd   :  { %s382_s14 = sshll.u32 %s592_s13, 4  ;;  %s383_s14 = int_to_ptr.vmem [resolvable:$true] %s382_s14 }
 0x2ce   :  { %s556_s17 = scalar_lea.vmem %s383_s14, 16  ;;  %s560_s18 = scalar_lea.vmem %s383_s14, 32 }
 0x2cf   :  { %p557_p6 = scmp.ne.s32.totalorder %s383_s14, %s556_s17  ;;  %p561_p7 = scmp.lt.s32.totalorder %s383_s14, %s383_s14 }
 0x2d0   :  { %p562_p8 = scmp.lt.s32.totalorder %s560_s18, %s556_s17 }
 0x2d2   :  { %p563_p9 = por %p562_p8, %p561_p7 }
 0x2d4   :  { %p564_p10 = pnand %p563_p9, %p557_p6 }
 0x352   :  { %v352_v0 = vpop.xlane.xlu0 %351 }
 0x353   :  { %v353_v60 = vrot.slane %v352_v0, 4 }
 0x355   :  { %v354_v61 = vadd.f32 %v353_v60, %v352_v0 }
 0x357   :  { %v355_v62 = vrot.slane %v354_v61, 2 }
 0x359   :  { %v356_v63 = vadd.f32 %v355_v62, %v354_v61 }
 0x35b   :  { %v357_v1 = vrot.slane %v356_v63, 1 }
 0x35d   :  { %v358_v2 = vadd.f32 %v357_v1, %v356_v63 }
 0x35f   :  { %457 = vpush %v358_v2 }
 0x390   :  { %s458_s15 = spop %457 }
 0x391   :  { %s362_s16 = smul.f32 0.0625, %s458_s15 }
 0x393   :  { %v363_v3 = vstv %s362_s16 }
 0x394   :  { %365 = vst.msk [vmem:[#allocation9] sm:$0x1] %vm364_vm11, %v363_v3 }
 0x395   :  { %567 = shalt.err (!%p564_p10)
}
 0x396   :  { %385 = dma.vmem_to_hbm [thread:$0]  %s383_s14, 16, %s668_s5, [#allocation10]  }
 0x397   :  { %580 = dma.done.wait [#allocation4], 64  }
 0x398   :  { %581 = vsyncadd [#allocation4], 4294967232 }
 0x399   :  { %582 = dma.done.wait [#allocation10], 16  }
 0x39a   :  { %583 = vsyncadd [#allocation10], 4294967280 }
 0x39b   :  { %392 = vsyncpa [#allocation3], 1 }
 0x39c   :  { %393 = vsyncpa [#allocation6], 1 }
 0x39d   :  { %394 = vsyncpa [#allocation4], 1 }
 0x39e   :  { %395 = vsyncpa [#allocation10], 1 }

</bundles_post_ra>
